<compile_context>
chip_gen: v6e
topology: v6e:2x2x1
jax: 0.10.0
libtpu: 0.0.40
codegen_flags: <defaults>
</compile_context>

<pallas_src>
import functools

import jax
import jax.numpy as jnp
from jax.experimental import pallas as pl
from jax.experimental.pallas import tpu as pltpu

_SUBLANE = 8
_LANE = 128


def _round_up(x, m):
    return (x + m - 1) // m * m


def _chip_config():
    """(ncores, vmem_budget_bytes) per TPU generation.

    Budgets stay under the per-generation *scoped* VMEM defaults
    (v5e 16 MiB, v6e 32 MiB, v7x 32 MiB) even after counting the f32
    in-kernel temporaries, so no vmem_limit_bytes override is required.
    """
    kind = ""
    try:
        kind = jax.devices()[0].device_kind.lower()
    except Exception:
        pass
    if "v7" in kind:
        # 2 TensorCores per chip; 64 MiB physical / 32 MiB scoped default per TC.
        return 2, 20 * 1024 * 1024
    if "v6" in kind:
        # Single TC; 128 MiB physical / 32 MiB scoped default.
        return 1, 20 * 1024 * 1024
    # v5e (16 MiB scoped default) or unknown: most conservative.
    return 1, 10 * 1024 * 1024


def _atloss_kernel(logits_ref, labels_ref, out_ref, *,
                   total_rows, rows_per_block, steps_per_core):
    c = pl.program_id(0)   # core-split index   (parallel)
    i = pl.program_id(1)   # batch-block index  (arbitrary / reduction)

    # Output tile is resident across the arbitrary axis -> init once per core.
    @pl.when(i == 0)
    def _():
        out_ref[...] = jnp.zeros_like(out_ref)

    logits = logits_ref[...].astype(jnp.float32)   # (TB, C)
    labels = labels_ref[...].astype(jnp.float32)   # (TB, C) raw (col 0 NOT zeroed)

    # ---- single fused exp pass at the global row max ----
    m = jnp.max(logits, axis=-1, keepdims=True)    # (TB, 1)
    e = jnp.exp(logits - m)                        # (TB, C), one EUP pass

    # Reduced-space identities (no (TB, C) mask temporaries):
    #   labels_z       = labels with column 0 zeroed
    #   sum(p_mask*e)  = sum(labels_z*e) + e[:,0]
    #   sum(n_mask*e)  = sum(e) - sum(labels_z*e)
    s_all = jnp.sum(e, axis=-1, keepdims=True)               # (TB, 1)
    s_lab = jnp.sum(labels * e, axis=-1, keepdims=True)      # (TB, 1)
    n_raw = jnp.sum(labels, axis=-1, keepdims=True)          # (TB, 1)
    d_raw = jnp.sum(labels * logits, axis=-1, keepdims=True) # (TB, 1)

    e0 = e[:, 0:1]
    x0 = logits[:, 0:1]
    l0 = labels[:, 0:1]

    s_lab_z = s_lab - l0 * e0          # sum(labels_z * e)
    n_pos = n_raw - l0                 # sum(labels_z)
    dot_pos = d_raw - l0 * x0          # sum(labels_z * logits)

    sum_p = s_lab_z + e0               # sum(p_mask * e)
    sum_n = s_all - s_lab_z            # sum(n_mask * e)

    # Tiny clamp: with a single global shift one of the masked sums can
    # underflow to 0 (-> -inf lse / 0*inf NaN).  Clamping keeps it finite and
    # keeps rows with no positive labels exact; only rows whose in-mask logits
    # sit >~88 below the global row max lose accuracy.
    tiny = jnp.float32(1e-38)
    lse1 = m + jnp.log(jnp.maximum(sum_p, tiny))
    lse2 = m + jnp.log(jnp.maximum(sum_n, tiny))

    # loss1 + loss2 folded into a single lane-sparse (TB, 1) expression.
    loss = n_pos * lse1 + lse2 - dot_pos - x0      # (TB, 1)

    # Ragged / clamped-duplicate tail masking only on blocks that overrun B.
    start = (c * steps_per_core + i) * rows_per_block
    is_full = start + rows_per_block <= total_rows

    @pl.when(is_full)
    def _():
        out_ref[...] += jnp.sum(loss)

    @pl.when(jnp.logical_not(is_full))
    def _():
        row = jax.lax.broadcasted_iota(jnp.int32, loss.shape, 0)
        # Keep a select (not multiply-by-mask): padded rows may hold NaN/Inf.
        out_ref[...] += jnp.sum(jnp.where(start + row < total_rows, loss, 0.0))

    # Finalize once per core: divide by the *global* batch size.
    @pl.when(i == steps_per_core - 1)
    def _():
        out_ref[...] *= jnp.float32(1.0 / total_rows)


def atloss(logits, labels, *, max_block_rows=4096):
    """Pallas implementation of ATLoss.forward.

    logits: (B, C) float array (f32/bf16; upcast to f32 inside the kernel).
    labels: (B, C) multi-hot array, column 0 = threshold class.  May be
            int8/bool/float; 1-byte labels cut HBM traffic (no wrapper casts).
    returns: scalar float32 loss (mean over rows of loss1 + loss2).
    """
    B, C = logits.shape
    assert labels.shape == (B, C)

    ncores, vmem_budget = _chip_config()

    lane_c = _round_up(C, _LANE)
    it_log = jnp.dtype(logits.dtype).itemsize
    it_lab = jnp.dtype(labels.dtype).itemsize

    # Honest per-row VMEM footprint: 2x double-buffered input tiles plus
    # ~6 f32 (tb, lane_c) in-kernel temporaries (logits_f32, e, labels_f32,
    # products, compiler slack).
    per_row_bytes = 2 * lane_c * (it_log + it_lab) + 6 * lane_c * 4

    # Row granule: 8 / 16 / 32 rows for 4 / 2 / 1-byte inputs (packed sublanes).
    granule = max(_SUBLANE, 32 // max(1, min(it_log, it_lab)))

    tb = min(max_block_rows, max(granule, vmem_budget // per_row_bytes))
    tb = max(granule, (tb // granule) * granule)
    tb = min(tb, _round_up(B, granule))   # never (much) larger than the batch

    nblocks = pl.cdiv(B, tb)
    steps_per_core = pl.cdiv(nblocks, ncores)

    # TODO(synk): for C << 128 (common ATLoss label counts), lane-pack
    # g = 128 // C rows per block via a wrapper-side reshape (B, C) -> (B//g, g*C)
    # with segmented in-kernel reductions to restore lane density.

    def in_index_map(c, i):
        # Clamp so a fully-out-of-range tail block re-reads the last real block;
        # its rows are zeroed inside the kernel via the row mask.
        return (jnp.minimum(c * steps_per_core + i, nblocks - 1), 0)

    kernel = functools.partial(
        _atloss_kernel,
        total_rows=B,
        rows_per_block=tb,
        steps_per_core=steps_per_core,
    )

    cost = pl.CostEstimate(
        flops=10 * B * C,
        transcendentals=B * (C + 2),
        bytes_accessed=B * C * (it_log + it_lab) + ncores * _SUBLANE * _LANE * 4,
    )

    out = pl.pallas_call(
        kernel,
        out_shape=jax.ShapeDtypeStruct((ncores * _SUBLANE, _LANE), jnp.float32),
        grid_spec=pltpu.PrefetchScalarGridSpec(
            num_scalar_prefetch=0,
            grid=(ncores, steps_per_core),
            in_specs=[
                pl.BlockSpec((tb, C), in_index_map),
                pl.BlockSpec((tb, C), in_index_map),
            ],
            out_specs=pl.BlockSpec((_SUBLANE, _LANE), lambda c, i: (c, 0)),
        ),
        # TODO(synk): on v7x, verify in a profile that the size-2 'parallel'
        # core axis actually shards across both TensorCores; if not, switch it
        # to pltpu.CORE_PARALLEL.
        compiler_params=pltpu.CompilerParams(
            dimension_semantics=("parallel", "arbitrary")),
        cost_estimate=cost,
    )(logits, labels)   # native dtypes passed straight through — no wrapper casts

    # Each core's tile holds (sum over its rows) / B broadcast across the tile.
    total = out[0, 0]
    for k in range(1, ncores):
        total = total + out[k * _SUBLANE, 0]
    return total


def _atloss_ref(logits, labels):
    """Pure-JAX reference mirroring the PyTorch semantics (for sanity check)."""
    logits = logits.astype(jnp.float32)
    labels = labels.astype(jnp.float32)
    th_label = jnp.zeros_like(labels).at[:, 0].set(1.0)
    labels = labels.at[:, 0].set(0.0)
    p_mask = labels + th_label
    n_mask = 1.0 - labels
    logit1 = logits - (1.0 - p_mask) * 1e30
    loss1 = -(jax.nn.log_softmax(logit1, axis=-1) * labels).sum(1)
    logit2 = logits - (1.0 - n_mask) * 1e30
    loss2 = -(jax.nn.log_softmax(logit2, axis=-1) * th_label).sum(1)
    return (loss1 + loss2).mean()


if __name__ == "__main__":
    key = jax.random.PRNGKey(0)
    k1, k2 = jax.random.split(key)

    # 56 relation candidates x 16 label classes (column 0 = threshold class).
    # B is not a multiple of the row granule so the tail-masking path is
    # exercised; labels are int8 to exercise the low-HBM-traffic label path.
    B, C = 56, 16
    logits = jax.random.normal(k1, (B, C), dtype=jnp.float32)
    labels_i8 = (jax.random.uniform(k2, (B, C)) > 0.7).astype(jnp.int8)

    loss = atloss(logits, labels_i8)
    jax.block_until_ready(loss)

    ref = _atloss_ref(logits, labels_i8.astype(jnp.float32))
    assert jnp.allclose(loss, ref, rtol=1e-5, atol=1e-5), (loss, ref)

    print("KERNEL_OK")
</pallas_src>

<mosaic_0001>
module attributes {stable_mosaic.version = 11 : i64} {
  func.func @_atloss_kernel(%arg0: i32, %arg1: i32, %arg2: memref<64x16xf32, #tpu.memory_space<vmem>>, %arg3: memref<64x16xi8, #tpu.memory_space<vmem>>, %arg4: memref<8x128xf32, #tpu.memory_space<vmem>>) attributes {dimension_semantics = [#tpu.dimension_semantics<parallel>, #tpu.dimension_semantics<arbitrary>], iteration_bounds = array<i64: 1, 1>, scalar_prefetch = 0 : i64, scratch_operands = 0 : i64, tpu.core_type = #tpu.core_type<tc>, window_params = [{transform_indices = @transform_0, window_bounds = array<i64: 64, 16>}, {transform_indices = @transform_1, window_bounds = array<i64: 64, 16>}, {transform_indices = @transform_2, window_bounds = array<i64: 8, 128>}]} {
    %c0_i32 = arith.constant 0 : i32
    %0 = arith.cmpi eq, %arg1, %c0_i32 : i32
    %1 = arith.extui %0 : i1 to i32
    %c0_i32_0 = arith.constant 0 : i32
    %2 = arith.cmpi ne, %1, %c0_i32_0 : i32
    scf.if %2 {
      %cst_15 = arith.constant 0.000000e+00 : f32
      %56 = vector.broadcast %cst_15 : f32 to vector<8x128xf32>
      %c0_16 = arith.constant 0 : index
      %c0_17 = arith.constant 0 : index
      %57 = vector.load %arg4[%c0_16, %c0_17] : memref<8x128xf32, #tpu.memory_space<vmem>>, vector<8x128xf32>
      tpu.vector_store %arg4[%c0_16, %c0_17], %56 {strides = array<i32>} : memref<8x128xf32, #tpu.memory_space<vmem>>, vector<8x128xf32>,
    } else {
    }
    %c0 = arith.constant 0 : index
    %c0_1 = arith.constant 0 : index
    %3 = vector.load %arg2[%c0, %c0_1] : memref<64x16xf32, #tpu.memory_space<vmem>>, vector<64x16xf32>
    %c0_2 = arith.constant 0 : index
    %c0_3 = arith.constant 0 : index
    %4 = vector.load %arg3[%c0_2, %c0_3] : memref<64x16xi8, #tpu.memory_space<vmem>>, vector<64x16xi8>
    %5 = arith.sitofp %4 : vector<64x16xi8> to vector<64x16xf32>
    %cst = arith.constant dense<0xFF800000> : vector<64xf32>
    %6 = vector.multi_reduction <maximumf>, %3, %cst [1] : vector<64x16xf32> to vector<64xf32>
    %7 = vector.shape_cast %6 : vector<64xf32> to vector<64x1xf32>
    %8 = vector.broadcast %7 : vector<64x1xf32> to vector<64x16xf32>
    %9 = arith.subf %3, %8 : vector<64x16xf32>
    %10 = math.exp %9 : vector<64x16xf32>
    %cst_4 = arith.constant dense<0.000000e+00> : vector<64xf32>
    %11 = vector.multi_reduction <add>, %10, %cst_4 [1] : vector<64x16xf32> to vector<64xf32>
    %12 = vector.shape_cast %11 : vector<64xf32> to vector<64x1xf32>
    %13 = arith.mulf %5, %10 : vector<64x16xf32>
    %cst_5 = arith.constant dense<0.000000e+00> : vector<64xf32>
    %14 = vector.multi_reduction <add>, %13, %cst_5 [1] : vector<64x16xf32> to vector<64xf32>
    %15 = vector.shape_cast %14 : vector<64xf32> to vector<64x1xf32>
    %cst_6 = arith.constant dense<0.000000e+00> : vector<64xf32>
    %16 = vector.multi_reduction <add>, %5, %cst_6 [1] : vector<64x16xf32> to vector<64xf32>
    %17 = vector.shape_cast %16 : vector<64xf32> to vector<64x1xf32>
    %18 = arith.mulf %5, %3 : vector<64x16xf32>
    %cst_7 = arith.constant dense<0.000000e+00> : vector<64xf32>
    %19 = vector.multi_reduction <add>, %18, %cst_7 [1] : vector<64x16xf32> to vector<64xf32>
    %20 = vector.shape_cast %19 : vector<64xf32> to vector<64x1xf32>
    %21 = vector.extract_strided_slice %10 {offsets = [0, 0], sizes = [64, 1], strides = [1, 1]} : vector<64x16xf32> to vector<64x1xf32>
    %22 = vector.extract_strided_slice %3 {offsets = [0, 0], sizes = [64, 1], strides = [1, 1]} : vector<64x16xf32> to vector<64x1xf32>
    %23 = vector.extract_strided_slice %5 {offsets = [0, 0], sizes = [64, 1], strides = [1, 1]} : vector<64x16xf32> to vector<64x1xf32>
    %24 = arith.mulf %23, %21 : vector<64x1xf32>
    %25 = arith.subf %15, %24 : vector<64x1xf32>
    %26 = arith.subf %17, %23 : vector<64x1xf32>
    %27 = arith.mulf %23, %22 : vector<64x1xf32>
    %28 = arith.subf %20, %27 : vector<64x1xf32>
    %29 = arith.addf %25, %21 : vector<64x1xf32>
    %30 = arith.subf %12, %25 : vector<64x1xf32>
    %cst_8 = arith.constant 9.99999935E-39 : f32
    %31 = vector.broadcast %cst_8 : f32 to vector<64x1xf32>
    %32 = arith.maximumf %29, %31 : vector<64x1xf32>
    %33 = math.log %32 : vector<64x1xf32>
    %34 = arith.addf %7, %33 : vector<64x1xf32>
    %cst_9 = arith.constant 9.99999935E-39 : f32
    %35 = vector.broadcast %cst_9 : f32 to vector<64x1xf32>
    %36 = arith.maximumf %30, %35 : vector<64x1xf32>
    %37 = math.log %36 : vector<64x1xf32>
    %38 = arith.addf %7, %37 : vector<64x1xf32>
    %39 = arith.mulf %26, %34 : vector<64x1xf32>
    %40 = arith.addf %39, %38 : vector<64x1xf32>
    %41 = arith.subf %40, %28 : vector<64x1xf32>
    %42 = arith.subf %41, %22 : vector<64x1xf32>
    %c1_i32 = arith.constant 1 : i32
    %43 = arith.muli %arg0, %c1_i32 : i32
    %44 = arith.addi %43, %arg1 : i32
    %c64_i32 = arith.constant 64 : i32
    %45 = arith.muli %44, %c64_i32 : i32
    %c64_i32_10 = arith.constant 64 : i32
    %46 = arith.addi %45, %c64_i32_10 : i32
    %c56_i32 = arith.constant 56 : i32
    %47 = arith.cmpi sle, %46, %c56_i32 : i32
    %48 = arith.extui %47 : i1 to i32
    %c0_i32_11 = arith.constant 0 : i32
    %49 = arith.cmpi ne, %48, %c0_i32_11 : i32
    scf.if %49 {
      %c0_15 = arith.constant 0 : index
      %c0_16 = arith.constant 0 : index
      %56 = vector.load %arg4[%c0_15, %c0_16] : memref<8x128xf32, #tpu.memory_space<vmem>>, vector<8x128xf32>
      %57 = vector.shape_cast %42 : vector<64x1xf32> to vector<1x64x1xf32>
      %cst_17 = arith.constant dense<0.000000e+00> : vector<1xf32>
      %58 = vector.multi_reduction <add>, %57, %cst_17 [1, 2] : vector<1x64x1xf32> to vector<1xf32>
      %59 = vector.shape_cast %58 : vector<1xf32> to vector<1x1x1xf32>
      %60 = vector.extract %59[0, 0, 0] : f32 from vector<1x1x1xf32>
      %61 = vector.broadcast %60 : f32 to vector<8x128xf32>
      %62 = arith.addf %56, %61 : vector<8x128xf32>
      %c0_18 = arith.constant 0 : index
      %c0_19 = arith.constant 0 : index
      %63 = vector.load %arg4[%c0_18, %c0_19] : memref<8x128xf32, #tpu.memory_space<vmem>>, vector<8x128xf32>
      tpu.vector_store %arg4[%c0_18, %c0_19], %62 {strides = array<i32>} : memref<8x128xf32, #tpu.memory_space<vmem>>, vector<8x128xf32>,
    } else {
    }
    %true = arith.constant true
    %50 = arith.xori %47, %true : i1
    %51 = arith.extui %50 : i1 to i32
    %c0_i32_12 = arith.constant 0 : i32
    %52 = arith.cmpi ne, %51, %c0_i32_12 : i32
    scf.if %52 {
      %56 = tpu.iota {dimensions = array<i32: 0>} : vector<64x1xi32>
      %c0_15 = arith.constant 0 : index
      %c0_16 = arith.constant 0 : index
      %57 = vector.load %arg4[%c0_15, %c0_16] : memref<8x128xf32, #tpu.memory_space<vmem>>, vector<8x128xf32>
      %58 = vector.broadcast %45 : i32 to vector<64x1xi32>
      %59 = arith.addi %58, %56 : vector<64x1xi32>
      %c56_i32_17 = arith.constant 56 : i32
      %60 = vector.broadcast %c56_i32_17 : i32 to vector<64x1xi32>
      %61 = arith.cmpi slt, %59, %60 : vector<64x1xi32>
      %cst_18 = arith.constant 0.000000e+00 : f32
      %62 = vector.broadcast %cst_18 : f32 to vector<64x1xf32>
      %63 = arith.select %61, %42, %62 : vector<64x1xi1>, vector<64x1xf32>
      %64 = vector.shape_cast %63 : vector<64x1xf32> to vector<1x64x1xf32>
      %cst_19 = arith.constant dense<0.000000e+00> : vector<1xf32>
      %65 = vector.multi_reduction <add>, %64, %cst_19 [1, 2] : vector<1x64x1xf32> to vector<1xf32>
      %66 = vector.shape_cast %65 : vector<1xf32> to vector<1x1x1xf32>
      %67 = vector.extract %66[0, 0, 0] : f32 from vector<1x1x1xf32>
      %68 = vector.broadcast %67 : f32 to vector<8x128xf32>
      %69 = arith.addf %57, %68 : vector<8x128xf32>
      %c0_20 = arith.constant 0 : index
      %c0_21 = arith.constant 0 : index
      %70 = vector.load %arg4[%c0_20, %c0_21] : memref<8x128xf32, #tpu.memory_space<vmem>>, vector<8x128xf32>
      tpu.vector_store %arg4[%c0_20, %c0_21], %69 {strides = array<i32>} : memref<8x128xf32, #tpu.memory_space<vmem>>, vector<8x128xf32>,
    } else {
    }
    %c0_i32_13 = arith.constant 0 : i32
    %53 = arith.cmpi eq, %arg1, %c0_i32_13 : i32
    %54 = arith.extui %53 : i1 to i32
    %c0_i32_14 = arith.constant 0 : i32
    %55 = arith.cmpi ne, %54, %c0_i32_14 : i32
    scf.if %55 {
      %c0_15 = arith.constant 0 : index
      %c0_16 = arith.constant 0 : index
      %56 = vector.load %arg4[%c0_15, %c0_16] : memref<8x128xf32, #tpu.memory_space<vmem>>, vector<8x128xf32>
      %cst_17 = arith.constant 0.0178571437 : f32
      %57 = vector.broadcast %cst_17 : f32 to vector<8x128xf32>
      %58 = arith.mulf %56, %57 : vector<8x128xf32>
      %c0_18 = arith.constant 0 : index
      %c0_19 = arith.constant 0 : index
      %59 = vector.load %arg4[%c0_18, %c0_19] : memref<8x128xf32, #tpu.memory_space<vmem>>, vector<8x128xf32>
      tpu.vector_store %arg4[%c0_18, %c0_19], %58 {strides = array<i32>} : memref<8x128xf32, #tpu.memory_space<vmem>>, vector<8x128xf32>,
    } else {
    }
    return
  }
  func.func @transform_0(%arg0: i32, %arg1: i32) -> (i32, i32) {
    %c1_i32 = arith.constant 1 : i32
    %0 = arith.muli %arg0, %c1_i32 : i32
    %1 = arith.addi %0, %arg1 : i32
    %c0_i32 = arith.constant 0 : i32
    %2 = arith.minsi %1, %c0_i32 : i32
    %c0_i32_0 = arith.constant 0 : i32
    %c0_i32_1 = arith.constant 0 : i32
    return %2, %c0_i32_0 : i32, i32
  }
  func.func @transform_1(%arg0: i32, %arg1: i32) -> (i32, i32) {
    %c1_i32 = arith.constant 1 : i32
    %0 = arith.muli %arg0, %c1_i32 : i32
    %1 = arith.addi %0, %arg1 : i32
    %c0_i32 = arith.constant 0 : i32
    %2 = arith.minsi %1, %c0_i32 : i32
    %c0_i32_0 = arith.constant 0 : i32
    %c0_i32_1 = arith.constant 0 : i32
    return %2, %c0_i32_0 : i32, i32
  }
  func.func @transform_2(%arg0: i32, %arg1: i32) -> (i32, i32) {
    %c0_i32 = arith.constant 0 : i32
    %c0_i32_0 = arith.constant 0 : i32
    return %arg0, %c0_i32 : i32, i32
  }
}

</mosaic_0001>

<bundles_post_ra>
// kernel: tpu_custom_call.1
= control target key start
LH: loop header
LB: loop body
LE: loop exit
PB: predicated region body
PF: predicated region fallthrough
CT: control target
= control target key end

     0   :  { %vm133_vm0 = vcmask 130048   ;;  %s948_s0 = inlined_call_operand.vmem [shape: f32[56,16], index: 0, kind: input, shape index: {}]   ;;  %s949_s1 = inlined_call_operand.vmem [shape: s8[56,16], index: 1, kind: input, shape index: {}]   ;;  %s950_s2 = inlined_call_operand.hbm [shape: f32[8,128], index: 2, kind: output, shape index: {}]  }
   0x1   :  { %v666_v0 = vld [vmem:[%s948_s0] sm:$0xff]  ;;  %v671_v1 = vld [vmem:[%s948_s0 + $0x8] sm:$0xff]  ;;  %v676_v2 = vld [vmem:[%s948_s0 + $0x10] sm:$0xff] }
   0x2   :  { %v134_v3 = vsel %vm133_vm0, %v666_v0, -inf  ;;  %v140_v4 = vsel %vm133_vm0, %v676_v2, -inf  ;;  %v685_v5 = vld [vmem:[%s948_s0 + $0x18] sm:$0xff] }
   0x3   :  { %135 = vmax.xlane.f32.xlu0 %v134_v3  ;;  %141 = vmax.xlane.f32.xlu1 %v140_v4 }
   0x4   :  { %7 = vsyncpa [#allocation3], 0  ;;  %v137_v6 = vsel %vm133_vm0, %v671_v1, -inf  ;;  %v143_v7 = vsel %vm133_vm0, %v685_v5, -inf  ;;  %v694_v8 = vld [vmem:[%s948_s0 + $0x20] sm:$0xff]  ;;  %v699_v9 = vld [vmem:[%s948_s0 + $0x28] sm:$0xff] }
   0x5   :  { %v146_v10 = vsel %vm133_vm0, %v694_v8, -inf  ;;  %v149_v11 = vsel %vm133_vm0, %v699_v9, -inf  ;;  %v708_v12 = vld [vmem:[%s948_s0 + $0x30] sm:$0xff]  ;;  %v566_v32 = vld [vmem:[%s949_s1] sm:$0xff]   ;;  %v578_v45 = vld [vmem:[%s949_s1 + $0x8] sm:$0xf]  }
   0x6   :  { %v152_v13 = vsel %vm133_vm0, %v708_v12, -inf  ;;  %v568_v35 = vunpack.c.1.s8 %v566_v32  ;;  %v572_v44 = vunpack.c.3.s8 %v566_v32  ;;  %v567_v50 = vunpack.c.0.s8 %v566_v32  ;;  %v115_v60 = vld [vmem:[%s949_s1 + $0xc] sm:$0x3]  ;;  %s647_s28 = smov [#allocation2]  }
   0x7   :  { %138 = vmax.xlane.f32.xlu0 %v137_v6  ;;  %144 = vmax.xlane.f32.xlu1 %v143_v7  ;;  %v575_v51 = vunpack.c.0.s8 %v578_v45  ;;  %v576_v53 = vunpack.c.1.s8 %v578_v45  ;;  %v571_v55 = vunpack.c.2.s8 %v566_v32  ;;  %v123_v4 = vunpack.c.0.s8 %v115_v60  ;;  %s545_s29 = sshll.u32 %s647_s28, 4  ;;  %s546_s29 = int_to_ptr.vmem [resolvable:$true] %s545_s29 }
   0x8   :  { %v747_v39 = vcvt.s32.f32 %v568_v35  ;;  %v768_v49 = vcvt.s32.f32 %v572_v44  ;;  %v780_v58 = vcvt.s32.f32 %v567_v50  ;;  %vm505_vm1 = vcmask 7168   ;;  %s625_s30 = scalar_lea.vmem %s546_s29, 128  ;;  %p630_p1 = scmp.lt.s32.totalorder %s546_s29, %s546_s29 }
   0x9   :  { %v782_v59 = vcvt.s32.f32 %v575_v51  ;;  %v789_v62 = vcvt.s32.f32 %v576_v53  ;;  %v793_v3 = vcvt.s32.f32 %v571_v55  ;;  %p626_p0 = scmp.ne.s32.totalorder %s546_s29, %s625_s30  ;;  %p631_p2 = scmp.lt.s32.totalorder %s625_s30, %s625_s30 }
   0xa   :  { %v847_v35 = vmul.f32 %v747_v39, %v671_v1 }
   0xb   :  { %147 = vmax.xlane.f32.xlu0 %v146_v10  ;;  %150 = vmax.xlane.f32.xlu1 %v149_v11  ;;  %v244_v32 = vsel %vm133_vm0, %v793_v3, 0.0  ;;  %v250_v44 = vsel %vm133_vm0, %v782_v59, 0.0  ;;  %v871_v51 = vmul.f32 %v782_v59, %v694_v8  ;;  %v879_v55 = vmul.f32 %v789_v62, %v699_v9  ;;  %p632_p3 = por %p631_p2, %p630_p1 }
   0xd   :  { %v282_v53 = vsel %vm133_vm0, %v871_v51, 0.0  ;;  %v285_v60 = vsel %vm133_vm0, %v879_v55, 0.0  ;;  %p633_p4 = pnand %p632_p3, %p626_p0 }
   0xf   :  { %153 = vmax.xlane.f32.xlu0 %v152_v13 }
  0x8c   :  { %v712_v14 = vpop.xlane.xlu0 %135  ;;  %v714_v15 = vpop.xlane.xlu1 %141 }
  0x8d   :  { %v158_v16 = vsub.f32 %v666_v0, %v712_v14  ;;  %v160_v17 = vsub.f32 %v676_v2, %v714_v15 }
  0x8f   :  { %v166_v18 = vmul.f32 1.442695, %v158_v16  ;;  %v170_v20 = vmul.f32 1.442695, %v160_v17 }
  0x90   :  { %v720_v19 = vpop.xlane.xlu0 %138  ;;  %v722_v21 = vpop.xlane.xlu1 %144 }
  0x91   :  { %583 = vpow2.f32 %v166_v18  ;;  %v159_v22 = vsub.f32 %v671_v1, %v720_v19  ;;  %v161_v23 = vsub.f32 %v685_v5, %v722_v21 }
  0x92   :  { %585 = vpow2.f32 %v170_v20  ;;  %v819_v20 = vcvt.s32.f32 %v123_v4 }
  0x93   :  { %v168_v24 = vmul.f32 1.442695, %v159_v22  ;;  %v172_v26 = vmul.f32 1.442695, %v161_v23 }
  0x94   :  { %v728_v25 = vpop.xlane.xlu0 %147  ;;  %v730_v27 = vpop.xlane.xlu1 %150 }
  0x95   :  { %587 = vpow2.f32 %v168_v24  ;;  %v162_v28 = vsub.f32 %v694_v8, %v728_v25  ;;  %v163_v31 = vsub.f32 %v699_v9, %v730_v27 }
  0x96   :  { %589 = vpow2.f32 %v172_v26 }
  0x97   :  { %v174_v33 = vmul.f32 1.442695, %v162_v28  ;;  %v176_v36 = vmul.f32 1.442695, %v163_v31  ;;  %v241_v31 = vsel %vm133_vm0, %v747_v39, 0.0 }
  0x98   :  { %v734_v29 = vpop.xlane.xlu0 %153 }
  0x99   :  { %v164_v30 = vsub.f32 %v708_v12, %v734_v29 }
  0x9b   :  { %v178_v34 = vmul.f32 1.442695, %v164_v30  ;;  %v238_v30 = vsel %vm133_vm0, %v780_v58, 0.0 }
  0x9d   :  { %591 = vpow2.f32 %v178_v34  ;;  %v843_v34 = vmul.f32 %v780_v58, %v666_v0 }
  0x9e   :  { %v743_v37 = vpop.eup %583  ;;  %593 = vpow2.f32 %v174_v33  ;;  %v247_v33 = vsel %vm133_vm0, %v768_v49, 0.0 }
  0x9f   :  { %v182_v38 = vsel %vm133_vm0, %v743_v37, 0.0  ;;  %v749_v40 = vpop.eup %585  ;;  %595 = vpow2.f32 %v176_v36  ;;  %v801_v10 = vmul.f32 %v743_v37, %v780_v58  ;;  %v270_v36 = vsel %vm133_vm0, %v843_v34, 0.0 }
  0xa0   :  { %183 = vadd.xlane.f32.xlu0 %v182_v38  ;;  %v188_v47 = vsel %vm133_vm0, %v749_v40, 0.0  ;;  %v817_v18 = vmul.f32 %v749_v40, %v793_v3  ;;  %v273_v38 = vsel %vm133_vm0, %v847_v35, 0.0 }
  0xa1   :  { %v214_v16 = vsel %vm133_vm0, %v801_v10, 0.0 }
  0xa2   :  { %v751_v41 = vpop.eup %587  ;;  %v220_v23 = vsel %vm133_vm0, %v817_v18, 0.0 }
  0xa3   :  { %v185_v42 = vsel %vm133_vm0, %v751_v41, 0.0  ;;  %v757_v43 = vmul.f32 %v751_v41, %v747_v39  ;;  %v766_v48 = vpop.eup %589 }
  0xa4   :  { %186 = vadd.xlane.f32.xlu1 %v185_v42  ;;  %v191_v52 = vsel %vm133_vm0, %v766_v48, 0.0  ;;  %v778_v57 = vmul.f32 %v766_v48, %v768_v49  ;;  %v855_v42 = vmul.f32 %v793_v3, %v676_v2 }
  0xa5   :  { %v217_v46 = vsel %vm133_vm0, %v757_v43, 0.0 }
  0xa6   :  { %218 = vadd.xlane.f32.xlu0 %v217_v46  ;;  %v223_v7 = vsel %vm133_vm0, %v778_v57, 0.0  ;;  %v276_v45 = vsel %vm133_vm0, %v855_v42, 0.0  ;;  %v863_v46 = vmul.f32 %v768_v49, %v685_v5 }
  0xa8   :  { %189 = vadd.xlane.f32.xlu1 %v188_v47  ;;  %v253_v47 = vsel %vm133_vm0, %v789_v62, 0.0  ;;  %v279_v50 = vsel %vm133_vm0, %v863_v46, 0.0 }
  0xaa   :  { %v772_v54 = vpop.eup %591 }
  0xab   :  { %v200_v56 = vsel %vm133_vm0, %v772_v54, 0.0  ;;  %v787_v61 = vpop.eup %593  ;;  %v827_v24 = vmul.f32 %v772_v54, %v819_v20 }
  0xac   :  { %192 = vadd.xlane.f32.xlu1 %v191_v52  ;;  %201 = vadd.xlane.f32.xlu0 %v200_v56  ;;  %v791_v63 = vpop.eup %595  ;;  %v194_v6 = vsel %vm133_vm0, %v787_v61, 0.0  ;;  %v805_v11 = vmul.f32 %v787_v61, %v782_v59  ;;  %v256_v52 = vsel %vm133_vm0, %v819_v20, 0.0  ;;  %v883_v56 = vmul.f32 %v819_v20, %v708_v12 }
  0xad   :  { %v809_v13 = vmul.f32 %v791_v63, %v789_v62  ;;  %v197_v26 = vsel %vm133_vm0, %v791_v63, 0.0  ;;  %v232_v28 = vsel %vm133_vm0, %v827_v24, 0.0 }
  0xae   :  { %v226_v17 = vsel %vm133_vm0, %v805_v11, 0.0  ;;  %v288_v4 = vsel %vm133_vm0, %v883_v56, 0.0 }
  0xaf   :  { %v229_v22 = vsel %vm133_vm0, %v809_v13, 0.0 }
  0xb0   :  { %195 = vadd.xlane.f32.xlu1 %v194_v6  ;;  %224 = vadd.xlane.f32.xlu0 %v223_v7 }
  0xb4   :  { %215 = vadd.xlane.f32.xlu1 %v214_v16  ;;  %227 = vadd.xlane.f32.xlu0 %v226_v17 }
  0xb8   :  { %221 = vadd.xlane.f32.xlu1 %v220_v23  ;;  %230 = vadd.xlane.f32.xlu0 %v229_v22 }
  0xbc   :  { %198 = vadd.xlane.f32.xlu1 %v197_v26  ;;  %233 = vadd.xlane.f32.xlu0 %v232_v28 }
  0xc0   :  { %239 = vadd.xlane.f32.xlu1 %v238_v30  ;;  %242 = vadd.xlane.f32.xlu0 %v241_v31 }
  0xc4   :  { %245 = vadd.xlane.f32.xlu1 %v244_v32  ;;  %248 = vadd.xlane.f32.xlu0 %v247_v33 }
  0xc8   :  { %271 = vadd.xlane.f32.xlu1 %v270_v36  ;;  %274 = vadd.xlane.f32.xlu0 %v273_v38 }
  0xcc   :  { %251 = vadd.xlane.f32.xlu1 %v250_v44  ;;  %277 = vadd.xlane.f32.xlu0 %v276_v45 }
  0xd0   :  { %254 = vadd.xlane.f32.xlu1 %v253_v47  ;;  %280 = vadd.xlane.f32.xlu0 %v279_v50 }
  0xd4   :  { %257 = vadd.xlane.f32.xlu1 %v256_v52  ;;  %283 = vadd.xlane.f32.xlu0 %v282_v53 }
  0xd8   :  { %286 = vadd.xlane.f32.xlu1 %v285_v60  ;;  %289 = vadd.xlane.f32.xlu0 %v288_v4 }
 0x129   :  { %v184_v6 = vpop.xlane.xlu0 %183 }
 0x12d   :  { %v187_v7 = vpop.xlane.xlu1 %186 }
 0x12f   :  { %v219_v16 = vpop.xlane.xlu0 %218 }
 0x130   :  { %v295_v17 = vsub.f32 %v219_v16, %v757_v43 }
 0x131   :  { %v190_v22 = vpop.xlane.xlu1 %189 }
 0x132   :  { %v319_v23 = vadd.f32 %v751_v41, %v295_v17  ;;  %v327_v26 = vsub.f32 %v187_v7, %v295_v17 }
 0x134   :  { %v335_v28 = vmax.f32 %v319_v23, 1e-38  ;;  %v367_v32 = vmax.f32 %v327_v26, 1e-38 }
 0x135   :  { %v193_v30 = vpop.xlane.xlu1 %192  ;;  %v202_v31 = vpop.xlane.xlu0 %201 }
 0x136   :  { %597 = vlog2.f32 %v335_v28 }
 0x137   :  { %599 = vlog2.f32 %v367_v32 }
 0x139   :  { %v196_v33 = vpop.xlane.xlu1 %195  ;;  %v225_v36 = vpop.xlane.xlu0 %224 }
 0x13a   :  { %v297_v38 = vsub.f32 %v225_v36, %v778_v57 }
 0x13c   :  { %v321_v44 = vadd.f32 %v766_v48, %v297_v38  ;;  %v329_v45 = vsub.f32 %v193_v30, %v297_v38 }
 0x13d   :  { %v216_v47 = vpop.xlane.xlu1 %215  ;;  %v228_v50 = vpop.xlane.xlu0 %227 }
 0x13e   :  { %v337_v43 = vmax.f32 %v321_v44, 1e-38  ;;  %v294_v52 = vsub.f32 %v216_v47, %v801_v10  ;;  %v298_v41 = vsub.f32 %v228_v50, %v805_v11  ;;  %v369_v53 = vmax.f32 %v329_v45, 1e-38 }
 0x140   :  { %601 = vlog2.f32 %v337_v43  ;;  %v318_v60 = vadd.f32 %v743_v37, %v294_v52  ;;  %v326_v4 = vsub.f32 %v184_v6, %v294_v52  ;;  %v322_v7 = vadd.f32 %v787_v61, %v298_v41 }
 0x141   :  { %v330_v16 = vsub.f32 %v196_v33, %v298_v41  ;;  %v222_v57 = vpop.xlane.xlu1 %221  ;;  %v231_v17 = vpop.xlane.xlu0 %230  ;;  %603 = vlog2.f32 %v369_v53 }
 0x142   :  { %v334_v48 = vmax.f32 %v318_v60, 1e-38  ;;  %v366_v23 = vmax.f32 %v326_v4, 1e-38  ;;  %v338_v26 = vmax.f32 %v322_v7, 1e-38  ;;  %v296_v28 = vsub.f32 %v222_v57, %v817_v18 }
 0x143   :  { %v370_v30 = vmax.f32 %v330_v16, 1e-38  ;;  %v299_v10 = vsub.f32 %v231_v17, %v809_v13  ;;  %v598_v33 = vpop.eup %597 }
 0x144   :  { %605 = vlog2.f32 %v334_v48  ;;  %v320_v11 = vadd.f32 %v749_v40, %v296_v28  ;;  %v328_v32 = vsub.f32 %v190_v22, %v296_v28  ;;  %v345_v50 = vmul.f32 0.6931472, %v598_v33  ;;  %v600_v43 = vpop.eup %599 }
 0x145   :  { %607 = vlog2.f32 %v366_v23  ;;  %v323_v37 = vadd.f32 %v791_v63, %v299_v10  ;;  %v199_v61 = vpop.xlane.xlu1 %198  ;;  %v234_v6 = vpop.xlane.xlu0 %233  ;;  %v377_v4 = vmul.f32 0.6931472, %v600_v43 }
 0x146   :  { %609 = vlog2.f32 %v338_v26  ;;  %v336_v36 = vmax.f32 %v320_v11, 1e-38  ;;  %v368_v38 = vmax.f32 %v328_v32, 1e-38  ;;  %v331_v44 = vsub.f32 %v199_v61, %v299_v10 }
 0x147   :  { %611 = vlog2.f32 %v370_v30  ;;  %v339_v18 = vmax.f32 %v323_v37, 1e-38  ;;  %v300_v45 = vsub.f32 %v234_v6, %v827_v24  ;;  %v359_v24 = vadd.f32 %v345_v50, %v720_v19 }
 0x148   :  { %613 = vlog2.f32 %v336_v36  ;;  %v371_v13 = vmax.f32 %v331_v44, 1e-38  ;;  %v391_v28 = vadd.f32 %v377_v4, %v720_v19 }
 0x149   :  { %615 = vlog2.f32 %v368_v38  ;;  %v324_v40 = vadd.f32 %v772_v54, %v300_v45  ;;  %v332_v22 = vsub.f32 %v202_v31, %v300_v45  ;;  %v240_v47 = vpop.xlane.xlu1 %239  ;;  %v243_v63 = vpop.xlane.xlu0 %242 }
 0x14a   :  { %617 = vlog2.f32 %v339_v18  ;;  %v303_v53 = vsub.f32 %v243_v63, %v747_v39  ;;  %v302_v38 = vsub.f32 %v240_v47, %v780_v58 }
 0x14b   :  { %619 = vlog2.f32 %v371_v13  ;;  %v340_v52 = vmax.f32 %v324_v40, 1e-38  ;;  %v372_v41 = vmax.f32 %v332_v22, 1e-38 }
 0x14c   :  { %v399_v31 = vmul.f32 %v359_v24, %v303_v53 }
 0x14d   :  { %v602_v60 = vpop.eup %601  ;;  %621 = vlog2.f32 %v340_v52  ;;  %v246_v7 = vpop.xlane.xlu1 %245 }
 0x14e   :  { %v249_v16 = vpop.xlane.xlu0 %248  ;;  %623 = vlog2.f32 %v372_v41  ;;  %v349_v54 = vmul.f32 0.6931472, %v602_v60  ;;  %v604_v57 = vpop.eup %603  ;;  %v407_v6 = vadd.f32 %v399_v31, %v391_v28  ;;  %v304_v53 = vsub.f32 %v246_v7, %v793_v3 }
 0x14f   :  { %v305_v23 = vsub.f32 %v249_v16, %v768_v49  ;;  %v381_v37 = vmul.f32 0.6931472, %v604_v57 }
 0x150   :  { %v361_v48 = vadd.f32 %v349_v54, %v722_v21 }
 0x151   :  { %v606_v17 = vpop.eup %605  ;;  %v272_v26 = vpop.xlane.xlu1 %271  ;;  %v393_v47 = vadd.f32 %v381_v37, %v722_v21 }
 0x152   :  { %v275_v39 = vpop.xlane.xlu0 %274  ;;  %v608_v30 = vpop.eup %607  ;;  %v343_v10 = vmul.f32 0.6931472, %v606_v17  ;;  %v401_v45 = vmul.f32 %v361_v48, %v305_v23  ;;  %v310_v24 = vsub.f32 %v272_v26, %v843_v34 }
 0x153   :  { %v311_v11 = vsub.f32 %v275_v39, %v847_v35  ;;  %v610_v32 = vpop.eup %609  ;;  %v375_v61 = vmul.f32 0.6931472, %v608_v30 }
 0x154   :  { %v612_v33 = vpop.eup %611  ;;  %v358_v36 = vadd.f32 %v343_v10, %v712_v14  ;;  %v351_v44 = vmul.f32 0.6931472, %v610_v32 }
 0x155   :  { %v614_v18 = vpop.eup %613  ;;  %v383_v49 = vmul.f32 0.6931472, %v612_v33  ;;  %v415_v19 = vsub.f32 %v407_v6, %v311_v11  ;;  %v252_v13 = vpop.xlane.xlu1 %251  ;;  %v390_v63 = vadd.f32 %v375_v61, %v712_v14 }
 0x156   :  { %v278_v40 = vpop.xlane.xlu0 %277  ;;  %v616_v22 = vpop.eup %615  ;;  %v398_v50 = vmul.f32 %v358_v36, %v302_v38  ;;  %v347_v35 = vmul.f32 0.6931472, %v614_v18  ;;  %v306_v43 = vsub.f32 %v252_v13, %v782_v59  ;;  %v362_v58 = vadd.f32 %v351_v44, %v728_v25 }
 0x157   :  { %v618_v52 = vpop.eup %617  ;;  %v379_v41 = vmul.f32 0.6931472, %v616_v22  ;;  %v423_v31 = vsub.f32 %v415_v19, %v671_v1  ;;  %v409_v59 = vadd.f32 %v401_v45, %v393_v47  ;;  %v394_v48 = vadd.f32 %v383_v49, %v728_v25 }
 0x158   :  { %v620_v60 = vpop.eup %619  ;;  %v360_v4 = vadd.f32 %v347_v35, %v714_v15  ;;  %v406_v16 = vadd.f32 %v398_v50, %v390_v63  ;;  %v353_v54 = vmul.f32 0.6931472, %v618_v52  ;;  %v402_v14 = vmul.f32 %v362_v58, %v306_v43 }
 0x159   :  { %v255_v57 = vpop.xlane.xlu1 %254  ;;  %v392_v21 = vadd.f32 %v379_v41, %v714_v15  ;;  %v385_v30 = vmul.f32 0.6931472, %v620_v60  ;;  %v312_v25 = vsub.f32 %v278_v40, %v855_v42  ;;  %v507_v18 = vsel %vm505_vm1, %v423_v31, 0.0 }
 0x15a   :  { %v281_v17 = vpop.xlane.xlu0 %280  ;;  %v622_v3 = vpop.eup %621  ;;  %v400_v7 = vmul.f32 %v360_v4, %v304_v53  ;;  %v414_v23 = vsub.f32 %v406_v16, %v310_v24  ;;  %v307_v28 = vsub.f32 %v255_v57, %v789_v62  ;;  %v363_v34 = vadd.f32 %v353_v54, %v730_v27 }
 0x15b   :  { %v624_v39 = vpop.eup %623  ;;  %v313_v26 = vsub.f32 %v281_v17, %v863_v46  ;;  %v355_v1 = vmul.f32 0.6931472, %v622_v3  ;;  %v410_v33 = vadd.f32 %v402_v14, %v394_v48  ;;  %v395_v42 = vadd.f32 %v385_v30, %v730_v27 }
 0x15c   :  { %v387_v10 = vmul.f32 0.6931472, %v624_v39  ;;  %v422_v11 = vsub.f32 %v414_v23, %v666_v0  ;;  %v408_v32 = vadd.f32 %v400_v7, %v392_v21  ;;  %v403_v37 = vmul.f32 %v363_v34, %v307_v28 }
 0x15d   :  { %v417_v61 = vsub.f32 %v409_v59, %v313_v26  ;;  %v258_v6 = vpop.xlane.xlu1 %257  ;;  %v364_v15 = vadd.f32 %v355_v1, %v734_v29 }
 0x15e   :  { %v284_v62 = vpop.xlane.xlu0 %283  ;;  %v506_v36 = vsel %vm505_vm1, %v422_v11, 0.0  ;;  %v416_v38 = vsub.f32 %v408_v32, %v312_v25  ;;  %v308_v44 = vsub.f32 %v258_v6, %v819_v20  ;;  %v396_v13 = vadd.f32 %v387_v10, %v734_v29 }
 0x15f   :  { %v314_v46 = vsub.f32 %v284_v62, %v871_v51  ;;  %v425_v0 = vsub.f32 %v417_v61, %v685_v5  ;;  %v508_v40 = vadd.f32 %v507_v18, %v506_v36  ;;  %v411_v50 = vadd.f32 %v403_v37, %v395_v42 }
 0x160   :  { %v424_v49 = vsub.f32 %v416_v38, %v676_v2  ;;  %v404_v45 = vmul.f32 %v364_v15, %v308_v44 }
 0x161   :  { %v418_v19 = vsub.f32 %v410_v33, %v314_v46  ;;  %v287_v22 = vpop.xlane.xlu1 %286  ;;  %v511_v2 = vsel %vm505_vm1, %v425_v0, 0.0 }
 0x162   :  { %v290_v35 = vpop.xlane.xlu0 %289  ;;  %v509_v20 = vsel %vm505_vm1, %v424_v49, 0.0  ;;  %v315_v63 = vsub.f32 %v287_v22, %v879_v55  ;;  %v412_v43 = vadd.f32 %v404_v45, %v396_v13 }
 0x163   :  { %v426_v51 = vsub.f32 %v418_v19, %v694_v8  ;;  %v510_v5 = vadd.f32 %v509_v20, %v508_v40  ;;  %v316_v27 = vsub.f32 %v290_v35, %v883_v56 }
 0x164   :  { %v419_v52 = vsub.f32 %v411_v50, %v315_v63 }
 0x165   :  { %v420_v41 = vsub.f32 %v412_v43, %v316_v27  ;;  %v512_v53 = vadd.f32 %v511_v2, %v510_v5  ;;  %v513_v58 = vsel %vm505_vm1, %v426_v51, 0.0 }
 0x166   :  { %v427_v29 = vsub.f32 %v419_v52, %v699_v9 }
 0x167   :  { %v428_v47 = vsub.f32 %v420_v41, %v708_v12  ;;  %v514_v60 = vadd.f32 %v513_v58, %v512_v53 }
 0x168   :  { %v515_v8 = vsel %vm505_vm1, %v427_v29, 0.0 }
 0x169   :  { %v516_v4 = vadd.f32 %v515_v8, %v514_v60  ;;  %v517_v55 = vsel %vm505_vm1, %v428_v47, 0.0 }
 0x16b   :  { %v518_v24 = vadd.f32 %v517_v55, %v516_v4 }
 0x16d   :  { %521 = vadd.xlane.f32.xlu1 %v518_v24 }
 0x1f6   :  { %v522_v56 = vpop.xlane.xlu1 %521 }
 0x1f7   :  { %v523_v16 = vrot.slane %v522_v56, 4 }
 0x1f9   :  { %v524_v54 = vadd.f32 %v523_v16, %v522_v56 }
 0x1fb   :  { %v525_v31 = vrot.slane %v524_v54, 2 }
 0x1fd   :  { %v526_v14 = vadd.f32 %v525_v31, %v524_v54 }
 0x1ff   :  { %v527_v57 = vrot.slane %v526_v14, 1 }
 0x201   :  { %v528_v59 = vadd.f32 %v527_v57, %v526_v14 }
 0x203   :  { %579 = vpush %v528_v59 }
 0x234   :  { %s580_s1 = spop %579 }
 0x235   :  { %v530_v9 = vstv %s580_s1 }
 0x236   :  { %v537_v12 = vmul.f32 0.017857144, %v530_v9 }
 0x238   :  { %538 = vst [vmem:[#allocation2] sm:$0xff] %v537_v12 }
 0x239   :  { %636 = shalt.err (!%p633_p4)
}
 0x23a   :  { %548 = dma.vmem_to_hbm [thread:$0]  %s546_s29, 128, %s950_s2, [#allocation3]  }
 0x23b   :  { %645 = dma.done.wait [#allocation3], 128  }
 0x23c   :  { %646 = vsyncadd [#allocation3], 4294967168 }
 0x23d   :  { %552 = vsyncpa [#allocation3], 1 }

</bundles_post_ra>
